<compile_context>
chip_gen: v7x
topology: tpu7x:2x2x1
jax: 0.10.0
libtpu: 0.0.40
codegen_flags: <defaults>
</compile_context>

<pallas_src>
import functools

import jax
import jax.numpy as jnp
from jax.experimental import pallas as pl
from jax.experimental.pallas import tpu as pltpu

_LANES = 128
_SUBLANES = 8


def _cdiv(a, b):
    return -(-a // b)


def _round_up(a, b):
    return _cdiv(a, b) * b


def _mixed_loss_kernel(x_ref, t_ref, out_ref,
                       focal_acc, inter_acc, denom_acc, *,
                       gamma, gamma_int, binary_target,
                       tile_rows, tiles_per_core, total_tiles, num_cores,
                       remaining_last):
    c = pl.program_id(0)          # core-split ("parallel") axis
    i = pl.program_id(1)          # per-core row-tile sweep ("arbitrary")

    @pl.when(i == 0)
    def _init():
        focal_acc[...] = jnp.zeros_like(focal_acc)
        inter_acc[...] = jnp.zeros_like(inter_acc)
        denom_acc[...] = jnp.zeros_like(denom_acc)

    # Global row-tile index (small; no element-level int32 index is ever formed).
    g = c * tiles_per_core + i

    def accumulate(valid_count):
        x = x_ref[...].astype(jnp.float32)
        t = t_ref[...].astype(jnp.float32)

        # One exp + one log per element:
        #   e            = exp(-|x|)
        #   softplus(-x) = relu(-x) + log(1 + e)
        #   sigmoid(x)   = (x >= 0 ? 1 : e) / (1 + e)
        e = jnp.exp(-jnp.abs(x))
        one_p_e = 1.0 + e
        sp = jnp.maximum(-x, 0.0) + jnp.log(one_p_e)
        bce = x - x * t + sp
        sig = jnp.where(x >= 0.0, 1.0, e) / one_p_e

        if binary_target and gamma_int is not None:
            # exp(logsigmoid(-x*(2t-1))) == t + sig - 2*t*sig for t in {0,1};
            # integer gamma -> pure-VPU repeated multiply, zero extra EUP work.
            p = t + sig - 2.0 * t * sig
            if gamma_int == 0:
                w = jnp.ones_like(p)
            else:
                w = p
                for _ in range(gamma_int - 1):
                    w = w * p
        elif binary_target:
            invprobs = -sp - t * x          # logsigmoid(-x*(2t-1)) for t in {0,1}
            w = jnp.exp(invprobs * gamma)
        else:
            # General (possibly soft) targets.
            z = -x * (t * 2.0 - 1.0)
            ez = jnp.exp(-jnp.abs(z))
            logsig = -(jnp.maximum(-z, 0.0) + jnp.log(1.0 + ez))
            w = jnp.exp(logsig * gamma)

        focal = w * bce

        if valid_count is not None:
            # Tail tile only: mask zero-padded / undefined block-padding elements.
            row = jax.lax.broadcasted_iota(jnp.int32, focal.shape, 0)
            lane = jax.lax.broadcasted_iota(jnp.int32, focal.shape, 1)
            valid = row * _LANES + lane < valid_count
            zero = jnp.zeros_like(focal)
            focal = jnp.where(valid, focal, zero)
            sig = jnp.where(valid, sig, zero)
            t = jnp.where(valid, t, zero)

        def vreg_sum(v):
            # Layout-preserving fold of the sublane-tile axis: pure VPU vreg adds.
            return v.reshape(tile_rows // _SUBLANES, _SUBLANES, _LANES).sum(axis=0)

        focal_acc[...] += vreg_sum(focal)
        inter_acc[...] += vreg_sum(sig * t)
        denom_acc[...] += vreg_sum(sig + t)

    tile_elems = tile_rows * _LANES
    last_masked = remaining_last < tile_elems
    has_dup = num_cores * tiles_per_core > total_tiles

    if not last_masked and not has_dup:
        # Common aligned case: no masking anywhere.
        accumulate(None)
    else:
        plain_limit = total_tiles - 1 if last_masked else total_tiles

        @pl.when(g < plain_limit)
        def _plain():
            accumulate(None)

        if last_masked:
            @pl.when(g == total_tiles - 1)
            def _tail():
                accumulate(remaining_last)
        # g >= total_tiles: duplicate (clamped) tile on the padded core -> contributes 0.

    @pl.when(i == tiles_per_core - 1)
    def _finalize():
        out_ref[0, 0, :, :] = focal_acc[...]
        out_ref[0, 1, :, :] = inter_acc[...]
        out_ref[0, 2, :, :] = denom_acc[...]


def mixed_loss(x, target, alpha=10.0, gamma=2.0, binary_target=True):
    """alpha * FocalLoss(gamma)(x, target) - log(dice(sigmoid(x), target)).

    Set binary_target=False if targets are not strictly {0, 1}.
    """
    if x.shape != target.shape:
        raise ValueError("Target size must be the same as input size")

    n = int(x.size)
    rows_needed = _cdiv(n, _LANES)
    rows8 = _round_up(max(rows_needed, 1), _SUBLANES)
    pad_elems = rows8 * _LANES - n

    xf = x.reshape(-1)
    tf = target.reshape(-1)
    if pad_elems:
        # Tiny pad (< 8 rows + partial lane row); tail tile masks it in-kernel.
        xf = jnp.pad(xf, (0, pad_elems))
        tf = jnp.pad(tf, (0, pad_elems))
    xf = xf.reshape(rows8, _LANES)
    tf = tf.reshape(rows8, _LANES)

    # Balanced row tiles (multiple of 8 sublanes), capped at 1024 rows (512 KiB f32/block).
    max_tile_rows = 1024
    n_blocks = max(1, _cdiv(rows8, max_tile_rows))
    tile_rows = _round_up(_cdiv(rows8, n_blocks), _SUBLANES)
    total_tiles = _cdiv(rows8, tile_rows)
    num_cores = min(2, total_tiles)               # v7x has 2 TCs; harmless on v5e/v6e
    tiles_per_core = _cdiv(total_tiles, num_cores)
    # Static (compile-time) element count inside the last real tile -> no int32 overflow.
    remaining_last = n - (total_tiles - 1) * tile_rows * _LANES

    gamma_f = float(gamma)
    gamma_int = int(round(gamma_f))
    if not (abs(gamma_f - gamma_int) < 1e-12 and 0 <= gamma_int <= 16):
        gamma_int = None

    kernel = functools.partial(
        _mixed_loss_kernel,
        gamma=gamma_f, gamma_int=gamma_int, binary_target=bool(binary_target),
        tile_rows=tile_rows, tiles_per_core=tiles_per_core,
        total_tiles=total_tiles, num_cores=num_cores,
        remaining_last=remaining_last)

    def in_map(c, i):
        g = c * tiles_per_core + i
        # Clamp the (possibly duplicated) padded tile of the last core to a valid block.
        return (jnp.minimum(g, total_tiles - 1), 0)

    in_bytes = int(xf.size * xf.dtype.itemsize + tf.size * tf.dtype.itemsize)
    out_bytes = num_cores * 3 * _SUBLANES * _LANES * 4

    parts = pl.pallas_call(
        kernel,
        out_shape=jax.ShapeDtypeStruct((num_cores, 3, _SUBLANES, _LANES), jnp.float32),
        grid_spec=pltpu.PrefetchScalarGridSpec(
            num_scalar_prefetch=0,
            grid=(num_cores, tiles_per_core),
            in_specs=[
                pl.BlockSpec((tile_rows, _LANES), in_map),
                pl.BlockSpec((tile_rows, _LANES), in_map),
            ],
            out_specs=pl.BlockSpec((1, 3, _SUBLANES, _LANES),
                                   lambda c, i: (c, 0, 0, 0)),
            scratch_shapes=[pltpu.VMEM((_SUBLANES, _LANES), jnp.float32)] * 3,
        ),
        compiler_params=pltpu.CompilerParams(
            dimension_semantics=("parallel", "arbitrary")),
        cost_estimate=pl.CostEstimate(
            flops=25 * n, transcendentals=3 * n,
            bytes_accessed=in_bytes + out_bytes),
    )(xf, tf)

    # Final tiny combine in the wrapper (per review): sum per-core (8,128) partials.
    focal_sum = jnp.sum(parts[:, 0])
    inter_sum = jnp.sum(parts[:, 1])
    denom_sum = jnp.sum(parts[:, 2])
    smooth = 1.0
    focal_mean = focal_sum / n
    dice = (2.0 * inter_sum + smooth) / (denom_sum + smooth)
    return alpha * focal_mean - jnp.log(dice)


def _reference_mixed_loss(x, target, alpha=10.0, gamma=2.0):
    x = x.astype(jnp.float32)
    t = target.astype(jnp.float32)
    max_val = jnp.maximum(-x, 0.0)
    bce = x - x * t + max_val + jnp.log(jnp.exp(-max_val) + jnp.exp(-x - max_val))
    invprobs = jax.nn.log_sigmoid(-x * (t * 2.0 - 1.0))
    focal = jnp.mean(jnp.exp(invprobs * gamma) * bce)
    sig = jax.nn.sigmoid(x).reshape(-1)
    tf = t.reshape(-1)
    smooth = 1.0
    dice = (2.0 * jnp.sum(sig * tf) + smooth) / (jnp.sum(sig) + jnp.sum(tf) + smooth)
    return alpha * focal - jnp.log(dice)


if __name__ == "__main__":
    key = jax.random.PRNGKey(0)
    k1, k2 = jax.random.split(key)

    # PyTorch-style NCHW inputs: logits and binary mask target.
    x = jax.random.normal(k1, (2, 4, 16, 16), dtype=jnp.float32)
    target = jax.random.bernoulli(k2, 0.3, (2, 4, 16, 16)).astype(jnp.float32)

    alpha, gamma = 10.0, 2.0

    loss = jax.block_until_ready(mixed_loss(x, target, alpha=alpha, gamma=gamma))
    ref = jax.block_until_ready(_reference_mixed_loss(x, target, alpha=alpha, gamma=gamma))

    assert jnp.allclose(loss, ref, rtol=1e-5, atol=1e-5), (loss, ref)
    print("KERNEL_OK")
</pallas_src>

<mosaic_0001>
module attributes {stable_mosaic.version = 11 : i64} {
  func.func @_mixed_loss_kernel(%arg0: i32, %arg1: i32, %arg2: memref<16x128xf32, #tpu.memory_space<vmem>>, %arg3: memref<16x128xf32, #tpu.memory_space<vmem>>, %arg4: memref<1x3x8x128xf32, #tpu.memory_space<vmem>>, %arg5: memref<8x128xf32, #tpu.memory_space<vmem>>, %arg6: memref<8x128xf32, #tpu.memory_space<vmem>>, %arg7: memref<8x128xf32, #tpu.memory_space<vmem>>) attributes {dimension_semantics = [#tpu.dimension_semantics<parallel>, #tpu.dimension_semantics<arbitrary>], iteration_bounds = array<i64: 1, 1>, scalar_prefetch = 0 : i64, scratch_operands = 3 : i64, tpu.core_type = #tpu.core_type<tc>, window_params = [{transform_indices = @transform_0, window_bounds = array<i64: 16, 128>}, {transform_indices = @transform_1, window_bounds = array<i64: 16, 128>}, {transform_indices = @transform_2, window_bounds = array<i64: 1, 3, 8, 128>}]} {
    %c0_i32 = arith.constant 0 : i32
    %0 = arith.cmpi eq, %arg1, %c0_i32 : i32
    %1 = arith.extui %0 : i1 to i32
    %c0_i32_0 = arith.constant 0 : i32
    %2 = arith.cmpi ne, %1, %c0_i32_0 : i32
    scf.if %2 {
      %cst_27 = arith.constant 0.000000e+00 : f32
      %52 = vector.broadcast %cst_27 : f32 to vector<8x128xf32>
      %c0_28 = arith.constant 0 : index
      %c0_29 = arith.constant 0 : index
      %53 = vector.load %arg5[%c0_28, %c0_29] : memref<8x128xf32, #tpu.memory_space<vmem>>, vector<8x128xf32>
      tpu.vector_store %arg5[%c0_28, %c0_29], %52 {strides = array<i32>} : memref<8x128xf32, #tpu.memory_space<vmem>>, vector<8x128xf32>,
      %cst_30 = arith.constant 0.000000e+00 : f32
      %54 = vector.broadcast %cst_30 : f32 to vector<8x128xf32>
      %c0_31 = arith.constant 0 : index
      %c0_32 = arith.constant 0 : index
      %55 = vector.load %arg6[%c0_31, %c0_32] : memref<8x128xf32, #tpu.memory_space<vmem>>, vector<8x128xf32>
      tpu.vector_store %arg6[%c0_31, %c0_32], %54 {strides = array<i32>} : memref<8x128xf32, #tpu.memory_space<vmem>>, vector<8x128xf32>,
      %cst_33 = arith.constant 0.000000e+00 : f32
      %56 = vector.broadcast %cst_33 : f32 to vector<8x128xf32>
      %c0_34 = arith.constant 0 : index
      %c0_35 = arith.constant 0 : index
      %57 = vector.load %arg7[%c0_34, %c0_35] : memref<8x128xf32, #tpu.memory_space<vmem>>, vector<8x128xf32>
      tpu.vector_store %arg7[%c0_34, %c0_35], %56 {strides = array<i32>} : memref<8x128xf32, #tpu.memory_space<vmem>>, vector<8x128xf32>,
    } else {
    }
    %c0 = arith.constant 0 : index
    %c0_1 = arith.constant 0 : index
    %3 = vector.load %arg2[%c0, %c0_1] : memref<16x128xf32, #tpu.memory_space<vmem>>, vector<16x128xf32>
    %c0_2 = arith.constant 0 : index
    %c0_3 = arith.constant 0 : index
    %4 = vector.load %arg3[%c0_2, %c0_3] : memref<16x128xf32, #tpu.memory_space<vmem>>, vector<16x128xf32>
    %5 = math.absf %3 : vector<16x128xf32>
    %cst = arith.constant 0.000000e+00 : f32
    %6 = vector.broadcast %cst : f32 to vector<16x128xf32>
    %7 = arith.subf %6, %5 : vector<16x128xf32>
    %8 = math.exp %7 : vector<16x128xf32>
    %cst_4 = arith.constant 1.000000e+00 : f32
    %9 = vector.broadcast %cst_4 : f32 to vector<16x128xf32>
    %10 = arith.addf %9, %8 : vector<16x128xf32>
    %cst_5 = arith.constant 0.000000e+00 : f32
    %11 = vector.broadcast %cst_5 : f32 to vector<16x128xf32>
    %12 = arith.subf %11, %3 : vector<16x128xf32>
    %cst_6 = arith.constant 0.000000e+00 : f32
    %13 = vector.broadcast %cst_6 : f32 to vector<16x128xf32>
    %14 = arith.maximumf %12, %13 : vector<16x128xf32>
    %15 = math.log %10 : vector<16x128xf32>
    %16 = arith.addf %14, %15 : vector<16x128xf32>
    %17 = arith.mulf %3, %4 : vector<16x128xf32>
    %18 = arith.subf %3, %17 : vector<16x128xf32>
    %19 = arith.addf %18, %16 : vector<16x128xf32>
    %cst_7 = arith.constant 0.000000e+00 : f32
    %20 = vector.broadcast %cst_7 : f32 to vector<16x128xf32>
    %21 = arith.cmpf oge, %3, %20 : vector<16x128xf32>
    %cst_8 = arith.constant 1.000000e+00 : f32
    %22 = vector.broadcast %cst_8 : f32 to vector<16x128xf32>
    %23 = arith.select %21, %22, %8 : vector<16x128xi1>, vector<16x128xf32>
    %24 = arith.divf %23, %10 : vector<16x128xf32>
    %25 = arith.addf %4, %24 : vector<16x128xf32>
    %cst_9 = arith.constant 2.000000e+00 : f32
    %26 = vector.broadcast %cst_9 : f32 to vector<16x128xf32>
    %27 = arith.mulf %26, %4 : vector<16x128xf32>
    %28 = arith.mulf %27, %24 : vector<16x128xf32>
    %29 = arith.subf %25, %28 : vector<16x128xf32>
    %30 = arith.mulf %29, %29 : vector<16x128xf32>
    %31 = arith.mulf %30, %19 : vector<16x128xf32>
    %c0_10 = arith.constant 0 : index
    %c0_11 = arith.constant 0 : index
    %32 = vector.load %arg5[%c0_10, %c0_11] : memref<8x128xf32, #tpu.memory_space<vmem>>, vector<8x128xf32>
    %33 = vector.shape_cast %31 : vector<16x128xf32> to vector<2x8x128xf32>
    %cst_12 = arith.constant dense<0.000000e+00> : vector<8x128xf32>
    %34 = vector.multi_reduction <add>, %33, %cst_12 [0] : vector<2x8x128xf32> to vector<8x128xf32>
    %35 = arith.addf %32, %34 : vector<8x128xf32>
    %c0_13 = arith.constant 0 : index
    %c0_14 = arith.constant 0 : index
    %36 = vector.load %arg5[%c0_13, %c0_14] : memref<8x128xf32, #tpu.memory_space<vmem>>, vector<8x128xf32>
    tpu.vector_store %arg5[%c0_13, %c0_14], %35 {strides = array<i32>} : memref<8x128xf32, #tpu.memory_space<vmem>>, vector<8x128xf32>,
    %c0_15 = arith.constant 0 : index
    %c0_16 = arith.constant 0 : index
    %37 = vector.load %arg6[%c0_15, %c0_16] : memref<8x128xf32, #tpu.memory_space<vmem>>, vector<8x128xf32>
    %38 = arith.mulf %24, %4 : vector<16x128xf32>
    %39 = vector.shape_cast %38 : vector<16x128xf32> to vector<2x8x128xf32>
    %cst_17 = arith.constant dense<0.000000e+00> : vector<8x128xf32>
    %40 = vector.multi_reduction <add>, %39, %cst_17 [0] : vector<2x8x128xf32> to vector<8x128xf32>
    %41 = arith.addf %37, %40 : vector<8x128xf32>
    %c0_18 = arith.constant 0 : index
    %c0_19 = arith.constant 0 : index
    %42 = vector.load %arg6[%c0_18, %c0_19] : memref<8x128xf32, #tpu.memory_space<vmem>>, vector<8x128xf32>
    tpu.vector_store %arg6[%c0_18, %c0_19], %41 {strides = array<i32>} : memref<8x128xf32, #tpu.memory_space<vmem>>, vector<8x128xf32>,
    %c0_20 = arith.constant 0 : index
    %c0_21 = arith.constant 0 : index
    %43 = vector.load %arg7[%c0_20, %c0_21] : memref<8x128xf32, #tpu.memory_space<vmem>>, vector<8x128xf32>
    %44 = arith.addf %24, %4 : vector<16x128xf32>
    %45 = vector.shape_cast %44 : vector<16x128xf32> to vector<2x8x128xf32>
    %cst_22 = arith.constant dense<0.000000e+00> : vector<8x128xf32>
    %46 = vector.multi_reduction <add>, %45, %cst_22 [0] : vector<2x8x128xf32> to vector<8x128xf32>
    %47 = arith.addf %43, %46 : vector<8x128xf32>
    %c0_23 = arith.constant 0 : index
    %c0_24 = arith.constant 0 : index
    %48 = vector.load %arg7[%c0_23, %c0_24] : memref<8x128xf32, #tpu.memory_space<vmem>>, vector<8x128xf32>
    tpu.vector_store %arg7[%c0_23, %c0_24], %47 {strides = array<i32>} : memref<8x128xf32, #tpu.memory_space<vmem>>, vector<8x128xf32>,
    %c0_i32_25 = arith.constant 0 : i32
    %49 = arith.cmpi eq, %arg1, %c0_i32_25 : i32
    %50 = arith.extui %49 : i1 to i32
    %c0_i32_26 = arith.constant 0 : i32
    %51 = arith.cmpi ne, %50, %c0_i32_26 : i32
    scf.if %51 {
      %c0_27 = arith.constant 0 : index
      %c0_28 = arith.constant 0 : index
      %52 = vector.load %arg5[%c0_27, %c0_28] : memref<8x128xf32, #tpu.memory_space<vmem>>, vector<8x128xf32>
      %c0_29 = arith.constant 0 : index
      %c0_30 = arith.constant 0 : index
      %c0_31 = arith.constant 0 : index
      %c0_32 = arith.constant 0 : index
      %53 = vector.load %arg4[%c0_29, %c0_30, %c0_31, %c0_32] : memref<1x3x8x128xf32, #tpu.memory_space<vmem>>, vector<1x1x8x128xf32>
      %54 = vector.shape_cast %53 : vector<1x1x8x128xf32> to vector<8x128xf32>
      %55 = vector.shape_cast %52 : vector<8x128xf32> to vector<1x1x8x128xf32>
      tpu.vector_store %arg4[%c0_29, %c0_30, %c0_31, %c0_32], %55 {strides = array<i32>} : memref<1x3x8x128xf32, #tpu.memory_space<vmem>>, vector<1x1x8x128xf32>,
      %c0_33 = arith.constant 0 : index
      %c0_34 = arith.constant 0 : index
      %56 = vector.load %arg6[%c0_33, %c0_34] : memref<8x128xf32, #tpu.memory_space<vmem>>, vector<8x128xf32>
      %c0_35 = arith.constant 0 : index
      %c1 = arith.constant 1 : index
      %c0_36 = arith.constant 0 : index
      %c0_37 = arith.constant 0 : index
      %57 = vector.load %arg4[%c0_35, %c1, %c0_36, %c0_37] : memref<1x3x8x128xf32, #tpu.memory_space<vmem>>, vector<1x1x8x128xf32>
      %58 = vector.shape_cast %57 : vector<1x1x8x128xf32> to vector<8x128xf32>
      %59 = vector.shape_cast %56 : vector<8x128xf32> to vector<1x1x8x128xf32>
      tpu.vector_store %arg4[%c0_35, %c1, %c0_36, %c0_37], %59 {strides = array<i32>} : memref<1x3x8x128xf32, #tpu.memory_space<vmem>>, vector<1x1x8x128xf32>,
      %c0_38 = arith.constant 0 : index
      %c0_39 = arith.constant 0 : index
      %60 = vector.load %arg7[%c0_38, %c0_39] : memref<8x128xf32, #tpu.memory_space<vmem>>, vector<8x128xf32>
      %c0_40 = arith.constant 0 : index
      %c2 = arith.constant 2 : index
      %c0_41 = arith.constant 0 : index
      %c0_42 = arith.constant 0 : index
      %61 = vector.load %arg4[%c0_40, %c2, %c0_41, %c0_42] : memref<1x3x8x128xf32, #tpu.memory_space<vmem>>, vector<1x1x8x128xf32>
      %62 = vector.shape_cast %61 : vector<1x1x8x128xf32> to vector<8x128xf32>
      %63 = vector.shape_cast %60 : vector<8x128xf32> to vector<1x1x8x128xf32>
      tpu.vector_store %arg4[%c0_40, %c2, %c0_41, %c0_42], %63 {strides = array<i32>} : memref<1x3x8x128xf32, #tpu.memory_space<vmem>>, vector<1x1x8x128xf32>,
    } else {
    }
    return
  }
  func.func @transform_0(%arg0: i32, %arg1: i32) -> (i32, i32) {
    %c1_i32 = arith.constant 1 : i32
    %0 = arith.muli %arg0, %c1_i32 : i32
    %1 = arith.addi %0, %arg1 : i32
    %c0_i32 = arith.constant 0 : i32
    %2 = arith.minsi %1, %c0_i32 : i32
    %c0_i32_0 = arith.constant 0 : i32
    %c0_i32_1 = arith.constant 0 : i32
    return %2, %c0_i32_0 : i32, i32
  }
  func.func @transform_1(%arg0: i32, %arg1: i32) -> (i32, i32) {
    %c1_i32 = arith.constant 1 : i32
    %0 = arith.muli %arg0, %c1_i32 : i32
    %1 = arith.addi %0, %arg1 : i32
    %c0_i32 = arith.constant 0 : i32
    %2 = arith.minsi %1, %c0_i32 : i32
    %c0_i32_0 = arith.constant 0 : i32
    %c0_i32_1 = arith.constant 0 : i32
    return %2, %c0_i32_0 : i32, i32
  }
  func.func @transform_2(%arg0: i32, %arg1: i32) -> (i32, i32, i32, i32) {
    %c0_i32 = arith.constant 0 : i32
    %c0_i32_0 = arith.constant 0 : i32
    %c0_i32_1 = arith.constant 0 : i32
    %c0_i32_2 = arith.constant 0 : i32
    return %arg0, %c0_i32, %c0_i32_0, %c0_i32_1 : i32, i32, i32, i32
  }
}

</mosaic_0001>

<bundles_post_ra>
// kernel: tpu_custom_call.1
= control target key start
LH: loop header
LB: loop body
LE: loop exit
PB: predicated region body
PF: predicated region fallthrough
CT: control target
= control target key end

     0   :  { %7 = vsyncpa [#allocation6], 0  ;;  %s318_s0 = inlined_call_operand.hbm [shape: f32[16,128], index: 0, kind: input, shape index: {}]   ;;  %s319_s1 = inlined_call_operand.hbm [shape: f32[16,128], index: 1, kind: input, shape index: {}]   ;;  %s320_s2 = inlined_call_operand.hbm [shape: f32[1,3,8,128], index: 2, kind: output, shape index: {}]  }
   0x1   :  { %8 = vsyncpa [#allocation9], 0 }
   0x2   :  { %9 = vsyncpa [#allocation7], 0  ;;  %s253_s9 = smov [#allocation5]   ;;  %s181_s13 = scalar_lea.hbm %s318_s0, 256 }
   0x3   :  { %s21_s10 = sshll.u32 %s253_s9, 4  ;;  %p182_p0 = scmp.ne.s32.totalorder %s318_s0, %s181_s13  ;;  %s22_s10 = int_to_ptr.vmem [resolvable:$true] %s21_s10 }
   0x4   :  { %p185_p1 = scmp.lt.u32.totalorder %s181_s13, %s318_s0 }
   0x6   :  { %p187_p2 = pnand %p185_p1, %p182_p0 }
   0x8   :  { %190 = shalt.err (!%p187_p2)
}
   0x9   :  { %s191_s18 = scalar_lea.vmem %s22_s10, 256  ;;  %p196_p4 = scmp.lt.s32.totalorder %s22_s10, %s22_s10 }
   0xa   :  { %p192_p3 = scmp.ne.s32.totalorder %s22_s10, %s191_s18  ;;  %p197_p5 = scmp.lt.s32.totalorder %s191_s18, %s191_s18 }
   0xc   :  { %p198_p6 = por %p197_p5, %p196_p4 }
   0xe   :  { %p199_p7 = pnand %p198_p6, %p192_p3 }
  0x10   :  { %202 = shalt.err (!%p199_p7)
}
  0x11   :  { %s254_s19 = smov 128   ;;  %s255_s20 = smov 8  }
  0x12   :  { %27 = dma.hbm_to_vmem [thread:$0]  %s318_s0, 256, %s22_s10, [#allocation6], %s254_s19, %s254_s19, %s255_s20  }
  0x13   :  { %s256_s23 = smov [#allocation8]   ;;  %s203_s27 = scalar_lea.hbm %s319_s1, 256 }
  0x14   :  { %s39_s24 = sshll.u32 %s256_s23, 4  ;;  %p204_p8 = scmp.ne.s32.totalorder %s319_s1, %s203_s27  ;;  %s40_s24 = int_to_ptr.vmem [resolvable:$true] %s39_s24 }
  0x15   :  { %p207_p9 = scmp.lt.u32.totalorder %s203_s27, %s319_s1 }
  0x17   :  { %p209_p10 = pnand %p207_p9, %p204_p8 }
  0x19   :  { %212 = shalt.err (!%p209_p10)
}
  0x1a   :  { %s213_s4 = scalar_lea.vmem %s40_s24, 256  ;;  %p218_p12 = scmp.lt.s32.totalorder %s40_s24, %s40_s24 }
  0x1b   :  { %p214_p11 = scmp.ne.s32.totalorder %s40_s24, %s213_s4  ;;  %p219_p13 = scmp.lt.s32.totalorder %s213_s4, %s213_s4 }
  0x1d   :  { %p220_p0 = por %p219_p13, %p218_p12 }
  0x1f   :  { %p221_p1 = pnand %p220_p0, %p214_p11 }
  0x21   :  { %224 = shalt.err (!%p221_p1)
}
  0x22   :  { %45 = dma.hbm_to_vmem [thread:$0]  %s319_s1, 256, %s40_s24, [#allocation9], %s254_s19, %s254_s19, %s255_s20  }
  0x23   :  { %247 = dma.done.wait [#allocation6], 256  }
  0x24   :  { %248 = vsyncadd [#allocation6], 4294967040 }
  0x25   :  { %249 = dma.done.wait [#allocation9], 256  }
  0x26   :  { %250 = vsyncadd [#allocation9], 4294967040  ;;  %v67_v0 = vld [vmem:[#allocation5] sm:$0xff]  ;;  %v68_v1 = vld [vmem:[#allocation5 + $0x8] sm:$0xff]  ;;  %s257_s1 = smov [#allocation10]  }
  0x27   :  { %v71_v2 = vand.u32 2147483647, %v67_v0  ;;  %v72_v3 = vand.u32 2147483647, %v68_v1  ;;  %v81_v12 = vsub.f32 0.0, %v67_v0  ;;  %v82_v13 = vsub.f32 0.0, %v68_v1 }
  0x28   :  { %vm97_vm0 = vcmp.ge.f32.partialorder %v67_v0, 0.0  ;;  %v69_v14 = vld [vmem:[#allocation8] sm:$0xff]  ;;  %vm98_vm1 = vcmp.ge.f32.partialorder %v68_v1, 0.0  ;;  %v70_v15 = vld [vmem:[#allocation8 + $0x8] sm:$0xff]  ;;  %s147_s6 = sshll.u32 %s257_s1, 4  ;;  %s148_s6 = int_to_ptr.vmem [resolvable:$true] %s147_s6 }
  0x29   :  { %v73_v4 = vsub.f32 0.0, %v71_v2  ;;  %v74_v5 = vsub.f32 0.0, %v72_v3  ;;  %v83_v16 = vmax.f32 %v81_v12, 0.0  ;;  %v91_v17 = vmul.f32 %v69_v14, %v67_v0  ;;  %s225_s7 = scalar_lea.vmem %s148_s6, 384  ;;  %p230_p3 = scmp.lt.s32.totalorder %s148_s6, %s148_s6 }
  0x2a   :  { %v84_v19 = vmax.f32 %v82_v13, 0.0  ;;  %v92_v20 = vmul.f32 %v70_v15, %v68_v1  ;;  %v107_v25 = vmul.f32 2.0, %v69_v14  ;;  %v108_v28 = vmul.f32 2.0, %v70_v15  ;;  %p226_p2 = scmp.ne.s32.totalorder %s148_s6, %s225_s7  ;;  %p231_p4 = scmp.lt.s32.totalorder %s225_s7, %s225_s7 }
  0x2b   :  { %v75_v6 = vmul.f32 1.442695, %v73_v4  ;;  %v77_v7 = vmul.f32 1.442695, %v74_v5  ;;  %v93_v31 = vsub.f32 %v67_v0, %v91_v17 }
  0x2c   :  { %v94_v34 = vsub.f32 %v68_v1, %v92_v20  ;;  %p232_p5 = por %p231_p4, %p230_p3 }
  0x2d   :  { %169 = vpow2.f32 %v75_v6 }
  0x2e   :  { %171 = vpow2.f32 %v77_v7  ;;  %p233_p6 = pnand %p232_p5, %p226_p2 }
  0x37   :  { %v170_v8 = vpop.eup %169 }
  0x38   :  { %v172_v9 = vpop.eup %171  ;;  %v79_v10 = vadd.f32 1.0, %v170_v8  ;;  %v99_v21 = vsel %vm97_vm0, 1.0, %v170_v8 }
  0x39   :  { %v80_v11 = vadd.f32 1.0, %v172_v9  ;;  %v100_v24 = vsel %vm98_vm1, 1.0, %v172_v9 }
  0x3a   :  { %173 = vlog2.f32 %v79_v10 }
  0x3b   :  { %175 = vlog2.f32 %v80_v11 }
  0x3c   :  { %177 = vrcp.f32 %v79_v10 }
  0x3d   :  { %179 = vrcp.f32 %v80_v11 }
  0x44   :  { %v174_v18 = vpop.eup %173 }
  0x45   :  { %v176_v22 = vpop.eup %175  ;;  %v86_v23 = vmul.f32 0.6931472, %v174_v18 }
  0x46   :  { %v178_v26 = vpop.eup %177  ;;  %v88_v27 = vmul.f32 0.6931472, %v176_v22 }
  0x47   :  { %v180_v29 = vpop.eup %179  ;;  %v89_v30 = vadd.f32 %v86_v23, %v83_v16  ;;  %v102_v32 = vmul.f32 %v178_v26, %v99_v21 }
  0x48   :  { %v90_v33 = vadd.f32 %v88_v27, %v84_v19  ;;  %v104_v35 = vmul.f32 %v180_v29, %v100_v24 }
  0x49   :  { %v105_v36 = vadd.f32 %v102_v32, %v69_v14  ;;  %v109_v37 = vmul.f32 %v107_v25, %v102_v32  ;;  %v122_v38 = vmul.f32 %v102_v32, %v69_v14  ;;  %v95_v42 = vadd.f32 %v93_v31, %v89_v30 }
  0x4a   :  { %v106_v39 = vadd.f32 %v104_v35, %v70_v15  ;;  %v110_v40 = vmul.f32 %v108_v28, %v104_v35  ;;  %v123_v41 = vmul.f32 %v104_v35, %v70_v15  ;;  %v96_v44 = vadd.f32 %v94_v34, %v90_v33 }
  0x4b   :  { %v111_v43 = vsub.f32 %v105_v36, %v109_v37 }
  0x4c   :  { %v112_v45 = vsub.f32 %v106_v39, %v110_v40  ;;  %v124_v46 = vadd.f32 %v123_v41, %v122_v38  ;;  %v128_v47 = vadd.f32 %v106_v39, %v105_v36 }
  0x4d   :  { %v113_v48 = vmul.f32 %v111_v43, %v111_v43 }
  0x4e   :  { %v114_v49 = vmul.f32 %v112_v45, %v112_v45  ;;  %138 = vst [vmem:[#allocation10 + $0x8] sm:$0xff] %v124_v46  ;;  %141 = vst [vmem:[#allocation10 + $0x10] sm:$0xff] %v128_v47 }
  0x4f   :  { %v115_v50 = vmul.f32 %v113_v48, %v95_v42 }
  0x50   :  { %v116_v51 = vmul.f32 %v114_v49, %v96_v44 }
  0x52   :  { %v118_v52 = vadd.f32 %v116_v51, %v115_v50 }
  0x54   :  { %135 = vst [vmem:[#allocation10] sm:$0xff] %v118_v52 }
  0x55   :  { %236 = shalt.err (!%p233_p6)
}
  0x56   :  { %s237_s10 = scalar_lea.hbm %s320_s2, 384 }
  0x57   :  { %p238_p7 = scmp.ne.s32.totalorder %s320_s2, %s237_s10  ;;  %p241_p8 = scmp.lt.u32.totalorder %s237_s10, %s320_s2 }
  0x59   :  { %p243_p9 = pnand %p241_p8, %p238_p7 }
  0x5b   :  { %246 = shalt.err (!%p243_p9)
}
  0x5c   :  { %153 = dma.vmem_to_hbm [thread:$0]  %s148_s6, 384, %s320_s2, [#allocation7], %s254_s19, %s254_s19, %s255_s20  }
  0x5d   :  { %251 = dma.done.wait [#allocation7], 384  }
  0x5e   :  { %252 = vsyncadd [#allocation7], 4294966912 }
  0x5f   :  { %157 = vsyncpa [#allocation6], 1 }
  0x60   :  { %158 = vsyncpa [#allocation9], 1 }
  0x61   :  { %159 = vsyncpa [#allocation7], 1 }

</bundles_post_ra>
